<compile_context>
chip_gen: v7x
topology: tpu7x:2x2x1
jax: 0.10.0
libtpu: 0.0.40
codegen_flags: <defaults>
</compile_context>

<pallas_src>
import functools

import jax
import jax.numpy as jnp
from jax.experimental import pallas as pl
from jax.experimental.pallas import tpu as pltpu


def _round_up(x, m):
    return ((x + m - 1) // m) * m


def parts_emb_kernel(emb_ref, coef_ref, w_ref, b_ref, out_ref, *, num_parts_p1, emb_size):
    """emb_ref (TM, P*E) native float dtype; coef_ref (TM, P+1) f32;
    w_ref (E, H) f32; b_ref (1, H) f32; out_ref (TM, H) f32."""
    coef = coef_ref[...]                                              # (TM, P+1)

    # Unrolled part-weighted accumulation over static 128-lane chunks.
    # Per-chunk upcast keeps live temporaries at (TM, E) instead of (TM, P*E).
    s = emb_ref[:, 0:emb_size].astype(jnp.float32) * coef[:, 0:1]     # (TM, E)
    for p in range(1, num_parts_p1):
        chunk = emb_ref[:, p * emb_size:(p + 1) * emb_size].astype(jnp.float32)
        s = s + chunk * coef[:, p:p + 1]

    y = jnp.dot(s, w_ref[...], preferred_element_type=jnp.float32)    # (TM, H)
    # coef[:, P] already carries gate * (1 + sum_{i>=1} v_i); gate also scales
    # every part coefficient, so masked / dropped rows come out exactly 0.
    out_ref[...] = y + b_ref[...] * coef[:, num_parts_p1:num_parts_p1 + 1]


def parts_embeddings_lin_proj(embeddings, visibility, feats_masks, drop_app,
                              w_t, b, *, tm=1024, vmem_limit_bytes=None):
    """embeddings [B,N,P,E] (f32 or bf16), visibility [B,N,P], feats_masks
    [B,N] bool, drop_app [B,N,1] in {0,1}, w_t [E,H] (= nn.Linear.weight.T),
    b [*,H].  Returns tokens [B,N,H] float32.

    NOTE: valid only because the PyTorch ModuleList is [nn.Linear]*(P+1), i.e.
    all parts share a single weight/bias (the module's actual construction)."""
    B, N, P, E = embeddings.shape
    H = w_t.shape[1]
    M = B * N

    # Row tile: multiple of 8, never larger than needed, and clamped to half of
    # M so the parallel grid axis has >= 2 steps (v7x dual-TensorCore sharding).
    tm = max(8, _round_up(min(tm, M), 8))
    tm = min(tm, max(8, _round_up(pl.cdiv(M, 2), 8)))
    grid_m = pl.cdiv(M, tm)

    # Dominant tensor stays in its native floating dtype (bf16 halves the HBM
    # read); non-float inputs are promoted.  Part axis flattened into lanes.
    if not jnp.issubdtype(embeddings.dtype, jnp.floating):
        embeddings = embeddings.astype(jnp.float32)
    emb = embeddings.reshape(M, P * E)                    # free, contiguous

    # Pack all per-row scalars into one coefficient array (M, P+1):
    #   cols 0..P-1 : gate * [v0, v1^2, ..., v_{P-1}^2]
    #   col  P      : gate * (1 + sum_{i>=1} v_i)     (bias scale)
    vis = visibility.reshape(M, P).astype(jnp.float32)
    gate = (feats_masks.reshape(M, 1).astype(jnp.float32)
            * (1.0 - drop_app.reshape(M, 1).astype(jnp.float32)))
    if P > 1:
        part_coef = jnp.concatenate([vis[:, :1], vis[:, 1:] * vis[:, 1:]], axis=1)
        bias_scale = 1.0 + jnp.sum(vis[:, 1:], axis=1, keepdims=True)
    else:
        part_coef = vis[:, :1]
        bias_scale = jnp.ones((M, 1), jnp.float32)
    coef = jnp.concatenate([part_coef, bias_scale], axis=1) * gate    # (M, P+1)

    w_t = w_t.astype(jnp.float32)
    b = b.reshape(1, H).astype(jnp.float32)

    # VMEM budget for the chosen tile (double-buffered), plus an explicit
    # allowance for the (TM, E)-sized in-register/VMEM temporaries.
    lane = 128
    emb_isz = jnp.dtype(emb.dtype).itemsize
    emb_tile = tm * _round_up(P * E, lane) * emb_isz
    coef_tile = tm * lane * 4
    out_tile = tm * _round_up(H, lane) * 4
    w_bytes = _round_up(E, 8) * _round_up(H, lane) * 4
    b_bytes = 8 * _round_up(H, lane) * 4
    temps = 4 * tm * _round_up(max(E, H), lane) * 4
    vmem_needed = 2 * (emb_tile + coef_tile + out_tile + w_bytes + b_bytes) + temps
    if vmem_limit_bytes is None:
        vmem_limit_bytes = min(max(int(vmem_needed) + (8 << 20), 16 << 20), 48 << 20)

    cost = pl.CostEstimate(
        flops=2 * M * E * H + 2 * M * P * E,
        transcendentals=0,
        bytes_accessed=M * (P * E * emb_isz + (P + 1) * 4 + H * 4) + (E + 1) * H * 4,
    )

    kernel = functools.partial(parts_emb_kernel, num_parts_p1=P, emb_size=E)

    out = pl.pallas_call(
        kernel,
        out_shape=jax.ShapeDtypeStruct((M, H), jnp.float32),
        grid_spec=pltpu.PrefetchScalarGridSpec(
            num_scalar_prefetch=0,
            grid=(grid_m,),
            in_specs=[
                pl.BlockSpec((tm, P * E), lambda i: (i, 0)),   # embeddings (flat parts)
                pl.BlockSpec((tm, P + 1), lambda i: (i, 0)),   # packed coefficients
                pl.BlockSpec((E, H),      lambda i: (0, 0)),   # W^T (shared)
                pl.BlockSpec((1, H),      lambda i: (0, 0)),   # bias
            ],
            out_specs=pl.BlockSpec((tm, H), lambda i: (i, 0)),
        ),
        compiler_params=pltpu.CompilerParams(
            dimension_semantics=("parallel",),
            vmem_limit_bytes=int(vmem_limit_bytes),
        ),
        cost_estimate=cost,
    )(emb, coef, w_t, b)
    return out.reshape(B, N, H)


def reference(embeddings, visibility, feats_masks, drop_app, w_t, b):
    """Pure-JAX mirror of the PyTorch forward (eval mode)."""
    emb = embeddings.astype(jnp.float32) * visibility[..., None]     # [B,N,P,E]
    P = emb.shape[2]
    w_t = w_t.astype(jnp.float32)
    b = b.reshape(1, -1).astype(jnp.float32)
    out = emb[..., 0, :] @ w_t + b                                   # linears[0]
    for i in range(1, P):
        out = out + (emb[..., i, :] @ w_t + b) * visibility[..., i:i + 1]
    out = out * (1.0 - drop_app.reshape(*drop_app.shape[:2], 1).astype(jnp.float32))
    out = out * feats_masks[..., None].astype(jnp.float32)
    return out.astype(jnp.float32)


def _make_inputs(key, B, N, P, emb_size, hidden_dim):
    k_emb, k_vis, k_mask, k_drop, k_w, k_b = jax.random.split(key, 6)
    embeddings = jax.random.normal(k_emb, (B, N, P, emb_size), dtype=jnp.float32)
    visibility = jax.random.uniform(k_vis, (B, N, P), dtype=jnp.float32)
    feats_masks = jax.random.bernoulli(k_mask, 0.75, (B, N))
    drop_app = jax.random.bernoulli(k_drop, 0.2, (B, N, 1)).astype(jnp.float32)
    bound = 1.0 / (emb_size ** 0.5)
    w = jax.random.uniform(k_w, (hidden_dim, emb_size), jnp.float32, -bound, bound)
    bias = jax.random.uniform(k_b, (hidden_dim,), jnp.float32, -bound, bound)
    return embeddings, visibility, feats_masks, drop_app, w.T, bias.reshape(1, hidden_dim)


if __name__ == "__main__":
    # Module hyperparameters (small but consistent with the module defaults).
    hidden_dim = 32
    num_parts = 5
    use_parts = True
    emb_size = 128
    P = num_parts + 1 if use_parts else 1

    key = jax.random.PRNGKey(0)
    k1, k2, k3 = jax.random.split(key, 3)

    # --- test 1: M = 16, default tile (clamped to M/2 => 2 grid steps) -------
    B, N = 2, 8
    emb, vis, mask, drop, w_t, b = _make_inputs(k1, B, N, P, emb_size, hidden_dim)
    tokens = parts_embeddings_lin_proj(emb, vis, mask, drop, w_t, b)
    tokens = jax.block_until_ready(tokens)
    ref = reference(emb, vis, mask, drop, w_t, b)
    assert tokens.shape == (B, N, hidden_dim)
    assert tokens.dtype == jnp.float32
    assert jnp.allclose(tokens, ref, atol=1e-4, rtol=1e-4), "mismatch vs reference (test 1)"

    # --- test 2: ragged M (21 rows) with a small explicit tile so the grid has
    # several steps and the last block overhangs (masked tail write path) -----
    B2, N2 = 3, 7
    emb2, vis2, mask2, drop2, w_t2, b2 = _make_inputs(k2, B2, N2, P, emb_size, hidden_dim)
    tokens2 = parts_embeddings_lin_proj(emb2, vis2, mask2, drop2, w_t2, b2, tm=8)
    tokens2 = jax.block_until_ready(tokens2)
    ref2 = reference(emb2, vis2, mask2, drop2, w_t2, b2)
    assert tokens2.shape == (B2, N2, hidden_dim)
    assert jnp.allclose(tokens2, ref2, atol=1e-4, rtol=1e-4), "mismatch vs reference (test 2)"

    # --- test 3: bf16 embeddings fast path (native dtype streamed, f32 math) -
    emb3, vis3, mask3, drop3, w_t3, b3 = _make_inputs(k3, B, N, P, emb_size, hidden_dim)
    emb3_bf16 = emb3.astype(jnp.bfloat16)
    tokens3 = parts_embeddings_lin_proj(emb3_bf16, vis3, mask3, drop3, w_t3, b3)
    tokens3 = jax.block_until_ready(tokens3)
    ref3 = reference(emb3_bf16.astype(jnp.float32), vis3, mask3, drop3, w_t3, b3)
    assert tokens3.dtype == jnp.float32
    assert jnp.allclose(tokens3, ref3, atol=2e-3, rtol=2e-3), "mismatch vs reference (test 3)"

    print("KERNEL_OK")
</pallas_src>

<mosaic_0001>
module attributes {stable_mosaic.version = 11 : i64} {
  func.func @parts_emb_kernel(%arg0: i32, %arg1: memref<8x768xf32, #tpu.memory_space<vmem>>, %arg2: memref<8x7xf32, #tpu.memory_space<vmem>>, %arg3: memref<128x32xf32, #tpu.memory_space<vmem>>, %arg4: memref<1x32xf32, #tpu.memory_space<vmem>>, %arg5: memref<8x32xf32, #tpu.memory_space<vmem>>) attributes {dimension_semantics = [#tpu.dimension_semantics<parallel>], iteration_bounds = array<i64: 2>, scalar_prefetch = 0 : i64, scratch_operands = 0 : i64, tpu.core_type = #tpu.core_type<tc>, window_params = [{transform_indices = @transform_0, window_bounds = array<i64: 8, 768>}, {transform_indices = @transform_1, window_bounds = array<i64: 8, 7>}, {pipeline_mode = #tpu.pipeline_mode<synchronous>, transform_indices = @transform_2, window_bounds = array<i64: 128, 32>}, {pipeline_mode = #tpu.pipeline_mode<synchronous>, transform_indices = @transform_3, window_bounds = array<i64: 1, 32>}, {transform_indices = @transform_4, window_bounds = array<i64: 8, 32>}]} {
    %c0 = arith.constant 0 : index
    %c0_0 = arith.constant 0 : index
    %0 = vector.load %arg2[%c0, %c0_0] : memref<8x7xf32, #tpu.memory_space<vmem>>, vector<8x7xf32>
    %c0_1 = arith.constant 0 : index
    %c0_2 = arith.constant 0 : index
    %1 = vector.load %arg1[%c0_1, %c0_2] : memref<8x768xf32, #tpu.memory_space<vmem>>, vector<8x128xf32>
    %2 = vector.extract_strided_slice %0 {offsets = [0, 0], sizes = [8, 1], strides = [1, 1]} : vector<8x7xf32> to vector<8x1xf32>
    %3 = vector.broadcast %2 : vector<8x1xf32> to vector<8x128xf32>
    %4 = arith.mulf %1, %3 : vector<8x128xf32>
    %c0_3 = arith.constant 0 : index
    %c128 = arith.constant 128 : index
    %5 = vector.load %arg1[%c0_3, %c128] : memref<8x768xf32, #tpu.memory_space<vmem>>, vector<8x128xf32>
    %6 = vector.extract_strided_slice %0 {offsets = [0, 1], sizes = [8, 1], strides = [1, 1]} : vector<8x7xf32> to vector<8x1xf32>
    %7 = vector.broadcast %6 : vector<8x1xf32> to vector<8x128xf32>
    %8 = arith.mulf %5, %7 : vector<8x128xf32>
    %9 = arith.addf %4, %8 : vector<8x128xf32>
    %c0_4 = arith.constant 0 : index
    %c256 = arith.constant 256 : index
    %10 = vector.load %arg1[%c0_4, %c256] : memref<8x768xf32, #tpu.memory_space<vmem>>, vector<8x128xf32>
    %11 = vector.extract_strided_slice %0 {offsets = [0, 2], sizes = [8, 1], strides = [1, 1]} : vector<8x7xf32> to vector<8x1xf32>
    %12 = vector.broadcast %11 : vector<8x1xf32> to vector<8x128xf32>
    %13 = arith.mulf %10, %12 : vector<8x128xf32>
    %14 = arith.addf %9, %13 : vector<8x128xf32>
    %c0_5 = arith.constant 0 : index
    %c384 = arith.constant 384 : index
    %15 = vector.load %arg1[%c0_5, %c384] : memref<8x768xf32, #tpu.memory_space<vmem>>, vector<8x128xf32>
    %16 = vector.extract_strided_slice %0 {offsets = [0, 3], sizes = [8, 1], strides = [1, 1]} : vector<8x7xf32> to vector<8x1xf32>
    %17 = vector.broadcast %16 : vector<8x1xf32> to vector<8x128xf32>
    %18 = arith.mulf %15, %17 : vector<8x128xf32>
    %19 = arith.addf %14, %18 : vector<8x128xf32>
    %c0_6 = arith.constant 0 : index
    %c512 = arith.constant 512 : index
    %20 = vector.load %arg1[%c0_6, %c512] : memref<8x768xf32, #tpu.memory_space<vmem>>, vector<8x128xf32>
    %21 = vector.extract_strided_slice %0 {offsets = [0, 4], sizes = [8, 1], strides = [1, 1]} : vector<8x7xf32> to vector<8x1xf32>
    %22 = vector.broadcast %21 : vector<8x1xf32> to vector<8x128xf32>
    %23 = arith.mulf %20, %22 : vector<8x128xf32>
    %24 = arith.addf %19, %23 : vector<8x128xf32>
    %c0_7 = arith.constant 0 : index
    %c640 = arith.constant 640 : index
    %25 = vector.load %arg1[%c0_7, %c640] : memref<8x768xf32, #tpu.memory_space<vmem>>, vector<8x128xf32>
    %26 = vector.extract_strided_slice %0 {offsets = [0, 5], sizes = [8, 1], strides = [1, 1]} : vector<8x7xf32> to vector<8x1xf32>
    %27 = vector.broadcast %26 : vector<8x1xf32> to vector<8x128xf32>
    %28 = arith.mulf %25, %27 : vector<8x128xf32>
    %29 = arith.addf %24, %28 : vector<8x128xf32>
    %c0_8 = arith.constant 0 : index
    %c0_9 = arith.constant 0 : index
    %30 = vector.load %arg3[%c0_8, %c0_9] : memref<128x32xf32, #tpu.memory_space<vmem>>, vector<128x32xf32>
    %cst = arith.constant dense<0.000000e+00> : vector<8x32xf32>
    %31 = tpu.matmul %29, %30, %cst {dimension_numbers = #tpu.dot_dimension_numbers<[1], [0], [0], [1], [0, 0, 1, 1], [], []>} : vector<8x128xf32>, vector<128x32xf32>, vector<8x32xf32> -> vector<8x32xf32>
    %c0_10 = arith.constant 0 : index
    %c0_11 = arith.constant 0 : index
    %32 = vector.load %arg4[%c0_10, %c0_11] : memref<1x32xf32, #tpu.memory_space<vmem>>, vector<1x32xf32>
    %33 = vector.extract_strided_slice %0 {offsets = [0, 6], sizes = [8, 1], strides = [1, 1]} : vector<8x7xf32> to vector<8x1xf32>
    %34 = vector.broadcast %32 : vector<1x32xf32> to vector<8x32xf32>
    %35 = vector.broadcast %33 : vector<8x1xf32> to vector<8x32xf32>
    %36 = arith.mulf %34, %35 : vector<8x32xf32>
    %37 = arith.addf %31, %36 : vector<8x32xf32>
    %c0_12 = arith.constant 0 : index
    %c0_13 = arith.constant 0 : index
    %38 = vector.load %arg5[%c0_12, %c0_13] : memref<8x32xf32, #tpu.memory_space<vmem>>, vector<8x32xf32>
    tpu.vector_store %arg5[%c0_12, %c0_13], %37 {strides = array<i32>} : memref<8x32xf32, #tpu.memory_space<vmem>>, vector<8x32xf32>,
    return
  }
  func.func @transform_0(%arg0: i32) -> (i32, i32) {
    %c0_i32 = arith.constant 0 : i32
    %c0_i32_0 = arith.constant 0 : i32
    return %arg0, %c0_i32 : i32, i32
  }
  func.func @transform_1(%arg0: i32) -> (i32, i32) {
    %c0_i32 = arith.constant 0 : i32
    %c0_i32_0 = arith.constant 0 : i32
    return %arg0, %c0_i32 : i32, i32
  }
  func.func @transform_2(%arg0: i32) -> (i32, i32) {
    %c0_i32 = arith.constant 0 : i32
    %c0_i32_0 = arith.constant 0 : i32
    %c0_i32_1 = arith.constant 0 : i32
    return %c0_i32, %c0_i32_0 : i32, i32
  }
  func.func @transform_3(%arg0: i32) -> (i32, i32) {
    %c0_i32 = arith.constant 0 : i32
    %c0_i32_0 = arith.constant 0 : i32
    %c0_i32_1 = arith.constant 0 : i32
    return %c0_i32, %c0_i32_0 : i32, i32
  }
  func.func @transform_4(%arg0: i32) -> (i32, i32) {
    %c0_i32 = arith.constant 0 : i32
    %c0_i32_0 = arith.constant 0 : i32
    return %arg0, %c0_i32 : i32, i32
  }
}

</mosaic_0001>

<bundles_post_ra>
// kernel: tpu_custom_call.1
= control target key start
LH: loop header
LB: loop body
LE: loop exit
PB: predicated region body
PF: predicated region fallthrough
CT: control target
= control target key end

     0   :  { %9 = vsyncpa [#allocation3], 0  ;;  %s845_s0 = inlined_call_operand.vmem [shape: f32[16,768], index: 0, kind: input, shape index: {}]   ;;  %s846_s1 = inlined_call_operand.vmem [shape: f32[16,7], index: 1, kind: input, shape index: {}]   ;;  %s847_s2 = inlined_call_operand.vmem [shape: f32[128,32], index: 2, kind: input, shape index: {}]   ;;  %s848_s3 = inlined_call_operand.vmem [shape: f32[1,32], index: 3, kind: input, shape index: {}]   ;;  %s849_s4 = inlined_call_operand.hbm [shape: f32[16,32], index: 4, kind: output, shape index: {}]  }
   0x1   :  { %11 = vsyncpa [#allocation3 + $0x1], 0  ;;  %s687_s15 = smov 0   ;;  %s689_s16 = smov 0  }
   0x2   :  { %s691_s17 = smov 0   ;;  %s693_s18 = smov 0  }
   0x3 LB: > { %s708_s19 = sadd.s32 4294967295, %s649_s18   ;;  %s441_s20 = sadd.s32 4294967294, %s649_s18   ;;  %s649_s18 = sphi %s693_s18, %s855_s18   ;;  %s645_s17 = sphi %s691_s17, %s854_s17   ;;  %s641_s16 = sphi %s689_s16, %s853_s16   ;;  %s637_s15 = sphi %s687_s15, %s852_s15  }
   0x4   : > { %s712_s21 = sadd.s32 1, %s649_s18   ;;  %s118_s22 = sadd.s32 1, %s645_s17 }
   0x5   : > { %s115_s23 = ssub.s32 %s649_s18, %s712_s21  ;;  %p128_p0 = scmp.ne.s32.totalorder %s645_s17, %s641_s16 }
   0x6   : > { %p116_p1 = scmp.eq.s32.totalorder %s115_s23, 0  ;;  %p129_p2 = scmp.eq.s32.totalorder %s708_s19, 1 }
   0x7   : > { %p134_p3 = scmp.ne.s32.totalorder %s641_s16, %s637_s15  ;;  %p135_p4 = scmp.eq.s32.totalorder %s441_s20, 1 }
   0x8   : > { %s723_s24 = scalar_select %p116_p1, %s645_s17, %s118_s22  }
   0x9   : > { %p725_p5 = por %p129_p2, %p128_p0  ;;  %p729_p6 = por %p135_p4, %p134_p3 }
   0xa   : > { %p444_p7 = scmp.ge.s32.totalorder %s649_s18, 1  ;;  %p174_p8 = scmp.lt.s32.totalorder %s649_s18, 3 }
   0xc   : > { %p175_p9 = pnand %p444_p7, %p174_p8 }
   0xd   : > { %p204_p10 = scmp.lt.s32.totalorder (!%p175_p9), %s708_s19, 1  ;;  %v256_v0 = vld [vmem:[%s847_s2] sm:$0xff] (!%p175_p9)  ;;  %v651_v1 = vmov (!%p175_p9), 0   ;;  %v652_v2 = vmov (!%p175_p9), 2   ;;  %v257_v3 = vld [vmem:[%s847_s2 + $0x8] sm:$0xff] (!%p175_p9)  ;;  %v258_v4 = vld [vmem:[%s847_s2 + $0x10] sm:$0xff] (!%p175_p9) }
   0xe   : > { %178 = sbr.rel (%p175_p9) target bundleno = 399 (0x18f), region = 36  ;;  %579 = vset.pattern.permute.xlu0 (!%p175_p9), %v651_v1  ;;  %581 = vset.pattern.permute.xlu1 (!%p175_p9), %v652_v2  ;;  %v259_v5 = vld [vmem:[%s847_s2 + $0x18] sm:$0xff] (!%p175_p9)  ;;  %v653_v6 = vmov (!%p175_p9), 0.0|0.0   ;;  %v506_v7 = vpack.c.bf16 (!%p175_p9), %v257_v3, %v256_v0  ;;  %v260_v10 = vld [vmem:[%s847_s2 + $0x20] sm:$0xff] (!%p175_p9)  ;;  %v261_v11 = vld [vmem:[%s847_s2 + $0x28] sm:$0xff] (!%p175_p9)  ;;  %v654_v13 = vmov (!%p175_p9), 1  }
   0xf   : > { %505 = vmatprep.subr.bf16.mxu0 (!%p175_p9), %v653_v6  ;;  %v509_v8 = vpack.c.bf16 (!%p175_p9), %v259_v5, %v258_v4  ;;  %v512_v12 = vpack.c.bf16 (!%p175_p9), %v261_v11, %v260_v10  ;;  %v655_v14 = vmov (!%p175_p9), 3   ;;  %v262_v15 = vld [vmem:[%s847_s2 + $0x30] sm:$0xff] (!%p175_p9)  ;;  %v263_v16 = vld [vmem:[%s847_s2 + $0x38] sm:$0xff] (!%p175_p9)  ;;  %v264_v18 = vld [vmem:[%s847_s2 + $0x40] sm:$0xff] (!%p175_p9)  ;;  %v656_v20 = vmov (!%p175_p9), 4  }
  0x10   : > { %507 = vmatpush3.bf16.msra.mxu0 (!%p175_p9), %v506_v7  ;;  %v515_v17 = vpack.c.bf16 (!%p175_p9), %v263_v16, %v262_v15  ;;  %v265_v19 = vld [vmem:[%s847_s2 + $0x48] sm:$0xff] (!%p175_p9)  ;;  %v657_v21 = vmov (!%p175_p9), 5   ;;  %v266_v23 = vld [vmem:[%s847_s2 + $0x50] sm:$0xff] (!%p175_p9)  ;;  %v267_v24 = vld [vmem:[%s847_s2 + $0x58] sm:$0xff] (!%p175_p9)  ;;  %vm658_vm0 = vmmov (!%p175_p9), 0   ;;  %v659_v28 = vmov (!%p175_p9), 0.0  }
  0x11   : > { %508 = vmatprep.subr.bf16.mxu0 (!%p175_p9), %v653_v6  ;;  %v518_v22 = vpack.c.bf16 (!%p175_p9), %v265_v19, %v264_v18  ;;  %v521_v25 = vpack.c.bf16 (!%p175_p9), %v267_v24, %v266_v23  ;;  %v268_v26 = vld [vmem:[%s847_s2 + $0x60] sm:$0xff] (!%p175_p9)  ;;  %v269_v27 = vld [vmem:[%s847_s2 + $0x68] sm:$0xff] (!%p175_p9)  ;;  %502 = vmatprep.mubr.msk.f32.mxu0 (!%p175_p9), %vm658_vm0, %v659_v28  ;;  %v660_v29 = vmov (!%p175_p9), 6   ;;  %v270_v31 = vld [vmem:[%s847_s2 + $0x70] sm:$0xff] (!%p175_p9)  ;;  %vm354_vm1 = vcmask (!%p175_p9), 261120  }
  0x12   : > { %v524_v30 = vpack.c.bf16 (!%p175_p9), %v269_v27, %v268_v26  ;;  %v271_v32 = vld [vmem:[%s847_s2 + $0x78] sm:$0xff] (!%p175_p9)  ;;  %v448_v57 = vld [vmem:[%s848_s3] ss:$0 sm:$0xff] (!%p175_p9) }
  0x13   : > { %v527_v33 = vpack.c.bf16 (!%p175_p9), %v271_v32, %v270_v31 }
  0x14   : > { %510 = vmatpush3.bf16.msra.mxu0 (!%p175_p9), %v509_v8 }
  0x15   : > { %s749_s9 = scalar_select %p204_p10, %s708_s19, 1  ;;  %511 = vmatprep.subr.bf16.mxu0 %v653_v6 }
  0x17   : > { %s447_s10 = sshll.u32 %s749_s9, 3  ;;  %s529_s5 = smul.u32 48, %s749_s9 }
  0x18   : > { %s212_s13 = scalar_lea.vmem %s846_s1, %s447_s10  ;;  %513 = vmatpush3.bf16.msra.mxu0 %v512_v12  ;;  %s201_s9 = sand.u32 1, %s641_s16  }
  0x19   : > { %v213_v9 = vld [vmem:[%s212_s13] sm:$0xff]  ;;  %514 = vmatprep.subr.bf16.mxu0 %v653_v6  ;;  %s208_s8 = scalar_lea.vmem %s845_s0, %s529_s5  ;;  %s445_s10 = sshll.u32 %s201_s9, 3 }
  0x1a   : > { %217 = vperm.xlu0 %579, %v213_v9   ;;  %230 = vperm.xlu1 %581, %v213_v9   ;;  %v214_v36 = vld [vmem:[%s208_s8] sm:$0xff]  ;;  %v221_v37 = vld [vmem:[%s208_s8 + $0x8] sm:$0xff]  ;;  %v228_v38 = vld [vmem:[%s208_s8 + $0x10] sm:$0xff]  ;;  %s450_s13 = sshll.u32 %s708_s19, 7  ;;  %s203_s14 = scalar_lea.vmem [#allocation2], %s445_s10 }
  0x1b   : > { %v235_v43 = vld [vmem:[%s208_s8 + $0x18] sm:$0xff]  ;;  %v242_v46 = vld [vmem:[%s208_s8 + $0x20] sm:$0xff]  ;;  %v249_v47 = vld [vmem:[%s208_s8 + $0x28] sm:$0xff]  ;;  %s370_s20 = sshll.u32 %s203_s14, 4  ;;  %s803_s27 = scalar_lea.hbm %s849_s4, %s450_s13  ;;  %s805_s20 = int_to_ptr.vmem [resolvable:$true] %s370_s20 }
  0x1c   : > { %516 = vmatpush3.bf16.msra.mxu0 %v515_v17  ;;  %s357_s28 = scalar_lea.sflag [#allocation3], %s201_s9  ;;  %s587_s29 = scalar_lea.vmem %s805_s20, 128 }
  0x1d   : > { %517 = vmatprep.subr.bf16.mxu0 %v653_v6  ;;  %p588_p11 = scmp.ne.s32.totalorder %s805_s20, %s587_s29  ;;  %s661_s19 = smov [#allocation2]  }
  0x1e   : > { %580 = vset.pattern.permute.xlu0 %v654_v13  ;;  %582 = vset.pattern.permute.xlu1 %v655_v14  ;;  %s591_s30 = sshll.u32 %s661_s19, 4  ;;  %s592_s30 = int_to_ptr.vmem [resolvable:$false] %s591_s30 }
  0x1f   : > { %223 = vperm.xlu0 %580, %v213_v9   ;;  %237 = vperm.xlu1 %582, %v213_v9   ;;  %p589_p12 = pnand %p588_p11, %p725_p5  ;;  %s593_s5 = scalar_lea.vmem %s592_s30, 256 }
  0x20   : > { %519 = vmatpush3.bf16.msra.mxu0 %v518_v22  ;;  %p594_p0 = scmp.lt.s32.totalorder %s805_s20, %s592_s30  ;;  %p595_p1 = scmp.lt.s32.totalorder %s593_s5, %s587_s29 }
  0x21   : > { %520 = vmatprep.subr.bf16.mxu0 %v653_v6  ;;  %p590_p13 = pneg %p589_p12 }
  0x22   : > { %p596_p2 = por %p595_p1, %p594_p0 }
  0x23   : > { %583 = vset.pattern.permute.xlu1 %v656_v20  ;;  %584 = vset.pattern.permute.xlu0 %v657_v21 }
  0x24   : > { %244 = vperm.xlu1 %583, %v213_v9   ;;  %251 = vperm.xlu0 %584, %v213_v9   ;;  %p597_p3 = pnand %p596_p2, %p590_p13 }
  0x25   : > { %522 = vmatpush3.bf16.msra.mxu0 %v521_v25 }
  0x26   : > { %523 = vmatprep.subr.bf16.mxu0 %v653_v6 }
  0x28   : > { %585 = vset.pattern.permute.xlu1 %v660_v29  ;;  %586 = vset.pattern.permute.xlu0 %v660_v29 }
  0x29   : > { %280 = vperm.xlu1 %585, %v213_v9   ;;  %525 = vmatpush3.bf16.msra.mxu0 %v524_v30 }
  0x2a   : > { %526 = vmatprep.subr.bf16.mxu0 %v653_v6 }
  0x2d   : > { %528 = vmatpush3.bf16.msra.mxu0 %v527_v33 }
  0x99   : > { %v218_v34 = vpop.permute.xlu0 %217  ;;  %v231_v35 = vpop.permute.xlu1 %230 }
  0x9a   : > { %v220_v41 = vmul.f32 %v218_v34, %v214_v36  ;;  %v233_v44 = vmul.f32 %v231_v35, %v228_v38 }
  0x9e   : > { %v224_v39 = vpop.permute.xlu0 %223  ;;  %v238_v40 = vpop.permute.xlu1 %237 }
  0x9f   : > { %v226_v42 = vmul.f32 %v224_v39, %v221_v37  ;;  %v240_v49 = vmul.f32 %v238_v40, %v235_v43 }
  0xa1   : > { %v227_v45 = vadd.f32 %v226_v42, %v220_v41 }
  0xa3   : > { %v234_v48 = vadd.f32 %v233_v44, %v227_v45  ;;  %v245_v50 = vpop.permute.xlu1 %244  ;;  %v252_v51 = vpop.permute.xlu0 %251 }
  0xa4   : > { %v247_v52 = vmul.f32 %v245_v50, %v242_v46  ;;  %v254_v54 = vmul.f32 %v252_v51, %v249_v47 }
  0xa5   : > { %v241_v53 = vadd.f32 %v240_v49, %v234_v48 }
  0xa7   : > { %v248_v55 = vadd.f32 %v247_v52, %v241_v53 }
  0xa8   : > { %v281_v58 = vpop.permute.xlu1 %280 }
  0xa9   : > { %v255_v56 = vadd.f32 %v254_v54, %v248_v55  ;;  %v283_v59 = vmul.f32 %v448_v57, %v281_v58 }
  0xab   : > { %503 = vmatmul.mubr.f32.vlgmr.msra.gmra.mrb[0].mxu0 %v255_v56 }
 0x17e   : > { %v350_v60 = vpop.f32.mrb[0].mxu0 }
 0x17f   : > { %v351_v61 = vadd.f32 %v350_v60, %v283_v59  ;;  %v504_v62 = vpop.f32.mrb[1].mxu0 }
 0x181   : > { %355 = vst.msk [vmem:[%s203_s14] sm:$0xff] %vm354_vm1, %v351_v61 }
 0x182   : > { %600 = shalt.err (!%p597_p3)
}
 0x183   : > { %s601_s6 = scalar_lea.hbm %s803_s27, 128  ;;  %s605_s9 = scalar_lea.hbm %s849_s4, 256 }
 0x184   : > { %p602_p4 = scmp.ne.s32.totalorder %s803_s27, %s601_s6  ;;  %p606_p9 = scmp.lt.u32.totalorder %s803_s27, %s849_s4 }
 0x185   : > { %p607_p10 = scmp.lt.u32.totalorder %s605_s9, %s601_s6  ;;  %p609_p12 = scmp.lt.u32.totalorder %s601_s6, %s803_s27 }
 0x186   : > { %p603_p7 = pnand %p602_p4, %p725_p5 }
 0x187   : > { %p608_p11 = por %p607_p10, %p606_p9 }
 0x188   : > { %p604_p8 = pneg %p603_p7 }
 0x189   : > { %p610_p13 = por %p609_p12, %p608_p11 }
 0x18b   : > { %p611_p0 = pnand %p610_p13, %p604_p8 }
 0x18d   : > { %614 = shalt.err (!%p611_p0)
}
 0x18e   : > { %530 = dma.vmem_to_hbm [thread:$0]  (%p725_p5), %s805_s20, 128, %s803_s27, %s357_s28  }
 0x18f PF: > { %p536_p1 = scmp.ge.s32.totalorder %s649_s18, 2  ;;  %s382_s12 = sand.u32 1, %s637_s15  }
 0x190   : > { %s383_s13 = scalar_lea.sflag [#allocation3], %s382_s12 }
 0x191   : > { %p533_p2 = pnand %p536_p1, %p729_p6 }
 0x193   : > { %632 = dma.done.wait (!%p533_p2), %s383_s13, 128  }
 0x194   : > { %634 = vsyncadd (!%p533_p2), %s383_s13, 4294967168  ;;  %p14_p3 = scmp.ge.s32.totalorder %s712_s21, 4   ;;  %s852_s15 = smov %s641_s16 }
 0x195   : > { %s853_s16 = smov %s645_s17  ;;  %s854_s17 = smov %s723_s24 }
 0x196   : > { %s855_s18 = smov %s712_s21  ;;  %16 = sbr.rel (!%p14_p3) target bundleno = 3 (0x3), region = 74 }
 0x19d   :  { %388 = vsyncpa [#allocation3], 1 }
 0x19e   :  { %390 = vsyncpa [#allocation3 + $0x1], 1 }

</bundles_post_ra>
